<compile_context>
chip_gen: v7x
topology: tpu7x:2x2x1
jax: 0.10.0
libtpu: 0.0.40
codegen_flags: <defaults>
</compile_context>

<pallas_src>
import jax
import jax.numpy as jnp
from jax.experimental import pallas as pl
from jax.experimental.pallas import tpu as pltpu


def _pos_token_kernel(x_ref, cls_ref, pos0_ref, pos_rest_ref, o_ref):
    # x_ref:        (Bblk, N,   D)  patch tokens for this batch block
    # cls_ref:      (1,    1,   D)  shared class token
    # pos0_ref:     (1,    1,   D)  positional embedding, row 0
    # pos_rest_ref: (1,    N,   D)  positional embedding, rows 1..N
    # o_ref:        (Bblk, N+1, D)  output block
    bblk = o_ref.shape[0]
    d = o_ref.shape[2]
    # Row 0: class token + pos[0], broadcast over the batch block.
    o_ref[:, 0:1, :] = jnp.broadcast_to(cls_ref[...] + pos0_ref[...], (bblk, 1, d))
    # Rows 1..N: x + pos[1:];  (1, N, D) broadcasts over (Bblk, N, D).
    o_ref[:, 1:, :] = x_ref[...] + pos_rest_ref[...]


def _pick_block_b(B, N, D, itemsize, block_b):
    """Choose a batch block: big enough to amortize per-step overhead, small enough
    that double-buffered x/out blocks fit comfortably in scoped VMEM, and (when
    possible) an exact divisor of B so no partial trailing block is needed."""
    if block_b is not None:
        return int(min(max(1, block_b), B))
    per_image_bytes = (N + (N + 1)) * D * itemsize          # x block + out block
    budget_bytes = 24 * 1024 * 1024                          # < v7x 32 MiB scoped default
    cap = max(1, budget_bytes // (2 * per_image_bytes))      # 2x for double buffering
    cap = int(min(cap, 16, B))
    # Prefer the largest divisor of B that is <= cap (avoids a ragged final block).
    for cand in range(cap, 0, -1):
        if B % cand == 0:
            return cand
    return cap


def pos_token_forward(x, class_token, pos_embd, *, block_b=None):
    """x: (B, N, D); class_token: (1, 1, D); pos_embd: (1, N+1, D) -> (B, N+1, D)."""
    B, N, D = x.shape
    assert class_token.shape == (1, 1, D)
    assert pos_embd.shape == (1, N + 1, D)

    # Wrapper-side split of pos_embd (removes per-step unaligned sublane reads
    # inside the kernel; done once, outside the grid loop).
    pos0 = pos_embd[:, :1, :]
    pos_rest = pos_embd[:, 1:, :]

    itemsize = jnp.dtype(x.dtype).itemsize
    block_b = _pick_block_b(B, N, D, itemsize, block_b)

    grid = (pl.cdiv(B, block_b),)
    out_shape = jax.ShapeDtypeStruct((B, N + 1, D), x.dtype)

    cost = pl.CostEstimate(
        flops=B * (N + 1) * D,  # one add per output element
        transcendentals=0,
        bytes_accessed=(B * N * D            # read x
                        + D                  # read class token
                        + (N + 1) * D        # read pos embedding
                        + B * (N + 1) * D    # write output
                        ) * itemsize,
    )

    return pl.pallas_call(
        _pos_token_kernel,
        out_shape=out_shape,
        grid_spec=pltpu.PrefetchScalarGridSpec(
            num_scalar_prefetch=0,
            grid=grid,
            in_specs=[
                pl.BlockSpec((block_b, N, D), lambda b: (b, 0, 0)),   # x: per-block slab
                pl.BlockSpec((1, 1, D), lambda b: (0, 0, 0)),         # class token (resident)
                pl.BlockSpec((1, 1, D), lambda b: (0, 0, 0)),         # pos row 0 (resident)
                pl.BlockSpec((1, N, D), lambda b: (0, 0, 0)),         # pos rows 1..N (resident)
            ],
            out_specs=pl.BlockSpec((block_b, N + 1, D), lambda b: (b, 0, 0)),
        ),
        compiler_params=pltpu.CompilerParams(
            # Keep the batch axis parallel so v7x's two TensorCores share the grid.
            dimension_semantics=("parallel",),
        ),
        cost_estimate=cost,
    )(x, class_token, pos0, pos_rest)


def pos_token_reference(x, class_token, pos_embd):
    B = x.shape[0]
    cls = jnp.broadcast_to(class_token, (B, 1, x.shape[-1]))
    return jnp.concatenate([cls, x], axis=1) + pos_embd


if __name__ == "__main__":
    # Small but lane-dense shapes: batch=6, num_patches=8, embedding_dim=128
    # (D multiple of 128 keeps output stores unmasked on the lane axis).
    B, N, D = 6, 8, 128

    key = jax.random.PRNGKey(0)
    k_x, k_cls, k_pos = jax.random.split(key, 3)

    x = jax.random.normal(k_x, (B, N, D), dtype=jnp.float32)
    # Deterministic "randn" parameter init (as in the PyTorch __init__).
    class_token = jax.random.normal(k_cls, (1, 1, D), dtype=jnp.float32)
    pos_embd = jax.random.normal(k_pos, (1, N + 1, D), dtype=jnp.float32)

    ref = pos_token_reference(x, class_token, pos_embd)

    # 1) Auto-sized batch block (single or few grid steps).
    out_auto = jax.block_until_ready(pos_token_forward(x, class_token, pos_embd))
    assert out_auto.shape == (B, N + 1, D)
    assert jnp.allclose(out_auto, ref, atol=1e-6, rtol=1e-6), "mismatch (auto block) vs reference"

    # 2) Explicit small batch block to exercise the multi-step batch-blocked grid path.
    out_blk = jax.block_until_ready(pos_token_forward(x, class_token, pos_embd, block_b=2))
    assert out_blk.shape == (B, N + 1, D)
    assert jnp.allclose(out_blk, ref, atol=1e-6, rtol=1e-6), "mismatch (block_b=2) vs reference"

    print("KERNEL_OK")
</pallas_src>

<mosaic_0001>
module attributes {stable_mosaic.version = 11 : i64} {
  func.func @_pos_token_kernel(%arg0: i32, %arg1: memref<6x8x128xf32, #tpu.memory_space<vmem>>, %arg2: memref<1x1x128xf32, #tpu.memory_space<vmem>>, %arg3: memref<1x1x128xf32, #tpu.memory_space<vmem>>, %arg4: memref<1x8x128xf32, #tpu.memory_space<vmem>>, %arg5: memref<6x9x128xf32, #tpu.memory_space<vmem>>) attributes {dimension_semantics = [#tpu.dimension_semantics<parallel>], iteration_bounds = array<i64: 1>, scalar_prefetch = 0 : i64, scratch_operands = 0 : i64, tpu.core_type = #tpu.core_type<tc>, window_params = [{transform_indices = @transform_0, window_bounds = array<i64: 6, 8, 128>}, {pipeline_mode = #tpu.pipeline_mode<synchronous>, transform_indices = @transform_1, window_bounds = array<i64: 1, 1, 128>}, {pipeline_mode = #tpu.pipeline_mode<synchronous>, transform_indices = @transform_2, window_bounds = array<i64: 1, 1, 128>}, {pipeline_mode = #tpu.pipeline_mode<synchronous>, transform_indices = @transform_3, window_bounds = array<i64: 1, 8, 128>}, {transform_indices = @transform_4, window_bounds = array<i64: 6, 9, 128>}]} {
    %c0 = arith.constant 0 : index
    %c0_0 = arith.constant 0 : index
    %c0_1 = arith.constant 0 : index
    %0 = vector.load %arg2[%c0, %c0_0, %c0_1] : memref<1x1x128xf32, #tpu.memory_space<vmem>>, vector<1x1x128xf32>
    %c0_2 = arith.constant 0 : index
    %c0_3 = arith.constant 0 : index
    %c0_4 = arith.constant 0 : index
    %1 = vector.load %arg3[%c0_2, %c0_3, %c0_4] : memref<1x1x128xf32, #tpu.memory_space<vmem>>, vector<1x1x128xf32>
    %2 = arith.addf %0, %1 : vector<1x1x128xf32>
    %3 = vector.shape_cast %2 : vector<1x1x128xf32> to vector<1x1x128xf32>
    %4 = vector.broadcast %3 : vector<1x1x128xf32> to vector<6x1x128xf32>
    %c0_5 = arith.constant 0 : index
    %c0_6 = arith.constant 0 : index
    %c0_7 = arith.constant 0 : index
    %5 = vector.load %arg5[%c0_5, %c0_6, %c0_7] : memref<6x9x128xf32, #tpu.memory_space<vmem>>, vector<6x1x128xf32>
    tpu.vector_store %arg5[%c0_5, %c0_6, %c0_7], %4 {strides = array<i32>} : memref<6x9x128xf32, #tpu.memory_space<vmem>>, vector<6x1x128xf32>,
    %c0_8 = arith.constant 0 : index
    %c0_9 = arith.constant 0 : index
    %c0_10 = arith.constant 0 : index
    %6 = vector.load %arg1[%c0_8, %c0_9, %c0_10] : memref<6x8x128xf32, #tpu.memory_space<vmem>>, vector<6x8x128xf32>
    %c0_11 = arith.constant 0 : index
    %c0_12 = arith.constant 0 : index
    %c0_13 = arith.constant 0 : index
    %7 = vector.load %arg4[%c0_11, %c0_12, %c0_13] : memref<1x8x128xf32, #tpu.memory_space<vmem>>, vector<1x8x128xf32>
    %8 = vector.broadcast %7 : vector<1x8x128xf32> to vector<6x8x128xf32>
    %9 = arith.addf %6, %8 : vector<6x8x128xf32>
    %c0_14 = arith.constant 0 : index
    %c1 = arith.constant 1 : index
    %c0_15 = arith.constant 0 : index
    %10 = vector.load %arg5[%c0_14, %c1, %c0_15] : memref<6x9x128xf32, #tpu.memory_space<vmem>>, vector<6x8x128xf32>
    tpu.vector_store %arg5[%c0_14, %c1, %c0_15], %9 {strides = array<i32>} : memref<6x9x128xf32, #tpu.memory_space<vmem>>, vector<6x8x128xf32>,
    return
  }
  func.func @transform_0(%arg0: i32) -> (i32, i32, i32) {
    %c0_i32 = arith.constant 0 : i32
    %c0_i32_0 = arith.constant 0 : i32
    %c0_i32_1 = arith.constant 0 : i32
    return %arg0, %c0_i32, %c0_i32_0 : i32, i32, i32
  }
  func.func @transform_1(%arg0: i32) -> (i32, i32, i32) {
    %c0_i32 = arith.constant 0 : i32
    %c0_i32_0 = arith.constant 0 : i32
    %c0_i32_1 = arith.constant 0 : i32
    %c0_i32_2 = arith.constant 0 : i32
    return %c0_i32, %c0_i32_0, %c0_i32_1 : i32, i32, i32
  }
  func.func @transform_2(%arg0: i32) -> (i32, i32, i32) {
    %c0_i32 = arith.constant 0 : i32
    %c0_i32_0 = arith.constant 0 : i32
    %c0_i32_1 = arith.constant 0 : i32
    %c0_i32_2 = arith.constant 0 : i32
    return %c0_i32, %c0_i32_0, %c0_i32_1 : i32, i32, i32
  }
  func.func @transform_3(%arg0: i32) -> (i32, i32, i32) {
    %c0_i32 = arith.constant 0 : i32
    %c0_i32_0 = arith.constant 0 : i32
    %c0_i32_1 = arith.constant 0 : i32
    %c0_i32_2 = arith.constant 0 : i32
    return %c0_i32, %c0_i32_0, %c0_i32_1 : i32, i32, i32
  }
  func.func @transform_4(%arg0: i32) -> (i32, i32, i32) {
    %c0_i32 = arith.constant 0 : i32
    %c0_i32_0 = arith.constant 0 : i32
    %c0_i32_1 = arith.constant 0 : i32
    return %arg0, %c0_i32, %c0_i32_0 : i32, i32, i32
  }
}

</mosaic_0001>

<bundles_post_ra>
// kernel: tpu_custom_call.1
= control target key start
LH: loop header
LB: loop body
LE: loop exit
PB: predicated region body
PF: predicated region fallthrough
CT: control target
= control target key end

     0   :  { %9 = vsyncpa [#allocation3], 0  ;;  %s91_s15 = smov [#allocation2]   ;;  %s176_s0 = inlined_call_operand.hbm [shape: f32[6,8,128], index: 0, kind: input, shape index: {}]   ;;  %s177_s1 = inlined_call_operand.vmem [shape: f32[1,1,128], index: 1, kind: input, shape index: {}]   ;;  %s178_s2 = inlined_call_operand.vmem [shape: f32[1,1,128], index: 2, kind: input, shape index: {}]   ;;  %s179_s3 = inlined_call_operand.vmem [shape: f32[1,8,128], index: 3, kind: input, shape index: {}]   ;;  %s180_s4 = inlined_call_operand.vmem [shape: f32[6,9,128], index: 4, kind: output, shape index: {}]  }
   0x1   :  { %s15_s16 = sshll.u32 %s91_s15, 4  ;;  %s67_s19 = scalar_lea.hbm %s176_s0, 768  ;;  %s16_s16 = int_to_ptr.vmem [resolvable:$true] %s15_s16 }
   0x2   :  { %p68_p0 = scmp.ne.s32.totalorder %s176_s0, %s67_s19  ;;  %p71_p1 = scmp.lt.u32.totalorder %s67_s19, %s176_s0 }
   0x4   :  { %p73_p2 = pnand %p71_p1, %p68_p0 }
   0x6   :  { %76 = shalt.err (!%p73_p2)
}
   0x7   :  { %s77_s24 = scalar_lea.vmem %s16_s16, 768  ;;  %p82_p4 = scmp.lt.s32.totalorder %s16_s16, %s16_s16 }
   0x8   :  { %p78_p3 = scmp.ne.s32.totalorder %s16_s16, %s77_s24  ;;  %p83_p5 = scmp.lt.s32.totalorder %s77_s24, %s77_s24 }
   0xa   :  { %p84_p6 = por %p83_p5, %p82_p4 }
   0xc   :  { %p85_p7 = pnand %p84_p6, %p78_p3 }
   0xe   :  { %88 = shalt.err (!%p85_p7)
}
   0xf   :  { %s92_s25 = smov 128   ;;  %s93_s26 = smov 8  }
  0x10   :  { %21 = dma.hbm_to_vmem [thread:$0]  %s176_s0, 768, %s16_s16, [#allocation3], %s92_s25, %s92_s25, %s93_s26  }
  0x11   :  { %89 = dma.done.wait [#allocation3], 768  }
  0x12   :  { %90 = vsyncadd [#allocation3], 4294966528  ;;  %v31_v0 = vld [vmem:[%s177_s1] sm:$0x1]  ;;  %v41_v5 = vld [vmem:[#allocation2 + $0x8] sm:$0xff] }
  0x13   :  { %v32_v1 = vld [vmem:[%s178_s2] sm:$0x1]  ;;  %v42_v6 = vld [vmem:[#allocation2 + $0x10] sm:$0xff]  ;;  %v43_v10 = vld [vmem:[#allocation2 + $0x18] sm:$0xff] }
  0x14   :  { %v40_v2 = vld [vmem:[#allocation2] sm:$0xff]  ;;  %v33_v3 = vadd.f32 %v32_v1, %v31_v0  ;;  %v45_v12 = vld [vmem:[#allocation2 + $0x28] sm:$0xff] }
  0x15   :  { %v46_v4 = vld [vmem:[%s179_s3] sm:$0xff] }
  0x16   :  { %v47_v7 = vadd.f32 %v46_v4, %v40_v2  ;;  %v48_v8 = vadd.f32 %v46_v4, %v41_v5  ;;  %v49_v9 = vadd.f32 %v46_v4, %v42_v6  ;;  %v44_v11 = vld [vmem:[#allocation2 + $0x20] sm:$0xff]  ;;  %34 = vst [vmem:[%s180_s4] sm:$0x1] %v33_v3  ;;  %35 = vst [vmem:[%s180_s4 + $0x10] sm:$0x1] %v33_v3 }
  0x17   :  { %36 = vst [vmem:[%s180_s4 + $0x20] sm:$0x1] %v33_v3  ;;  %37 = vst [vmem:[%s180_s4 + $0x30] sm:$0x1] %v33_v3  ;;  %v50_v13 = vadd.f32 %v46_v4, %v43_v10  ;;  %v51_v14 = vadd.f32 %v46_v4, %v44_v11  ;;  %v52_v15 = vadd.f32 %v46_v4, %v45_v12 }
  0x18   :  { %38 = vst [vmem:[%s180_s4 + $0x40] sm:$0x1] %v33_v3  ;;  %39 = vst [vmem:[%s180_s4 + $0x50] sm:$0x1] %v33_v3 }
  0x19   :  { %53 = vst [vmem:[%s180_s4 + $0x1] sm:$0xff] %v47_v7  ;;  %54 = vst [vmem:[%s180_s4 + $0x11] sm:$0xff] %v48_v8 }
  0x1a   :  { %55 = vst [vmem:[%s180_s4 + $0x21] sm:$0xff] %v49_v9  ;;  %56 = vst [vmem:[%s180_s4 + $0x31] sm:$0xff] %v50_v13 }
  0x1b   :  { %57 = vst [vmem:[%s180_s4 + $0x41] sm:$0xff] %v51_v14  ;;  %58 = vst [vmem:[%s180_s4 + $0x51] sm:$0xff] %v52_v15 }
  0x1c   :  { %63 = vsyncpa [#allocation3], 1 }

</bundles_post_ra>
